<compile_context>
chip_gen: v6e
topology: v6e:2x2x1
jax: 0.10.0
libtpu: 0.0.40
codegen_flags: <defaults>
</compile_context>

<pallas_src>
import functools
import math

import jax
import jax.numpy as jnp
from jax.experimental import pallas as pl
from jax.experimental.pallas import tpu as pltpu


def _sdpa_kernel(*refs, scale, has_mask, return_comp):
    if has_mask:
        q_ref, k_ref, v_ref, m_ref = refs[:4]
        out_refs = refs[4:]
    else:
        (q_ref, k_ref, v_ref), m_ref = refs[:3], None
        out_refs = refs[3:]
    if return_comp:
        out_ref, attn_ref, comp_ref = out_refs
    else:
        (out_ref, attn_ref), comp_ref = out_refs, None

    q = q_ref[...].astype(jnp.float32)          # (TB, Dk)
    k = k_ref[...].astype(jnp.float32)          # (TB, S, Dk)
    v = v_ref[...].astype(jnp.float32)          # (TB, S, Dv)

    # scores[b, s] = (q[b] . k[b, s]) * (1 / temperature)
    # One query per row -> VPU broadcast-multiply + lane reduce (no M=1 MXU).
    scores = jnp.sum(q[:, None, :] * k, axis=-1) * scale      # (TB, S)

    if has_mask:
        mask = m_ref[...]                                      # (TB, S) int32
        scores = jnp.where(mask != 0, jnp.float32(-1000.0), scores)

    if return_comp:
        comp_ref[...] = scores.astype(comp_ref.dtype)

    # Numerically-stable softmax over S; a single reciprocal per row.
    m = jnp.max(scores, axis=-1, keepdims=True)                # (TB, 1)
    e = jnp.exp(scores - m)                                    # (TB, S)
    denom = jnp.sum(e, axis=-1, keepdims=True)                 # (TB, 1)
    attn = e * pl.reciprocal(denom, approx=False)              # (TB, S)
    attn_ref[...] = attn.astype(attn_ref.dtype)

    # TODO(synk): attn_dropout (nn.Dropout(0.1)) omitted — eval-mode forward
    # (dropout is identity at inference).

    # out[b, :] = sum_s attn[b, s] * v[b, s, :]
    out = jnp.sum(attn[:, :, None] * v, axis=1)                # (TB, Dv)
    out_ref[...] = out.astype(out_ref.dtype)


def scaled_dot_product_attention(q, k, v, pad_mask=None, *, temperature,
                                 return_comp=False, block_b=None):
    """Pallas TPU forward of LTAE ScaledDotProductAttention (eval mode).

    q: (B, d_k), k: (B, S, d_k), v: (B, S, d_v), pad_mask: optional (B, S)
    (True / nonzero entries are padded positions, filled with -1000 pre-softmax).
    Returns (output, attn) shaped (B, 1, d_v) and (B, 1, S), matching the
    PyTorch module's q.unsqueeze(1) convention.  With return_comp=True, also
    returns comp (pre-softmax scores) shaped (B, 1, S).
    """
    q = q.astype(jnp.float32)
    k = k.astype(jnp.float32)
    v = v.astype(jnp.float32)
    B, Dk = q.shape
    Bk, S, Dk2 = k.shape
    Bv, Sv, Dv = v.shape
    assert B == Bk == Bv and S == Sv and Dk == Dk2, "shape mismatch"

    has_mask = pad_mask is not None

    # Row tiling over batch-heads: full S / Dk / Dv per block so the softmax
    # reduction is local to the block; the grid over rows gives double-buffered
    # DMA pipelining and megacore sharding for large B.
    if block_b is None:
        block_b = B if B <= 512 else 512   # 512-row f32 tiles stay well under VMEM
    TB = block_b
    grid = (pl.cdiv(B, TB),)

    in_arrays = [q, k, v]
    in_specs = [
        pl.BlockSpec((TB, Dk), lambda i: (i, 0)),
        pl.BlockSpec((TB, S, Dk), lambda i: (i, 0, 0)),
        pl.BlockSpec((TB, S, Dv), lambda i: (i, 0, 0)),
    ]
    if has_mask:
        in_arrays.append(pad_mask.astype(jnp.int32))
        in_specs.append(pl.BlockSpec((TB, S), lambda i: (i, 0)))

    out_shape = [
        jax.ShapeDtypeStruct((B, Dv), jnp.float32),   # output (pre-unsqueeze)
        jax.ShapeDtypeStruct((B, S), jnp.float32),    # attn   (post-softmax)
    ]
    out_specs = [
        pl.BlockSpec((TB, Dv), lambda i: (i, 0)),
        pl.BlockSpec((TB, S), lambda i: (i, 0)),
    ]
    if return_comp:
        out_shape.append(jax.ShapeDtypeStruct((B, S), jnp.float32))
        out_specs.append(pl.BlockSpec((TB, S), lambda i: (i, 0)))

    kernel = functools.partial(
        _sdpa_kernel,
        scale=1.0 / float(temperature),   # static multiply, no per-element divide
        has_mask=has_mask,
        return_comp=return_comp,
    )

    results = pl.pallas_call(
        kernel,
        grid=grid,
        in_specs=in_specs,
        out_specs=tuple(out_specs),
        out_shape=tuple(out_shape),
        compiler_params=pltpu.CompilerParams(
            dimension_semantics=("parallel",)),
    )(*in_arrays)

    if return_comp:
        out, attn, comp = results
        return out[:, None, :], attn[:, None, :], comp[:, None, :]
    out, attn = results
    return out[:, None, :], attn[:, None, :]


def _reference(q, k, v, pad_mask=None, *, temperature, return_comp=False):
    """Pure-JAX reference mirroring the PyTorch forward (eval mode)."""
    attn = jnp.einsum("bd,bsd->bs", q, k) / temperature
    if pad_mask is not None:
        attn = jnp.where(pad_mask, jnp.float32(-1000.0), attn)
    comp = attn
    attn = jax.nn.softmax(attn, axis=-1)
    out = jnp.einsum("bs,bsd->bd", attn, v)
    if return_comp:
        return out[:, None, :], attn[:, None, :], comp[:, None, :]
    return out[:, None, :], attn[:, None, :]


if __name__ == "__main__":
    key = jax.random.PRNGKey(0)
    n_head, batch, S, d_k, d_v = 4, 2, 8, 32, 32
    B = n_head * batch
    temperature = math.sqrt(d_k)

    kq, kk, kv = jax.random.split(key, 3)
    q = jax.random.normal(kq, (B, d_k), dtype=jnp.float32)
    k = jax.random.normal(kk, (B, S, d_k), dtype=jnp.float32)
    v = jax.random.normal(kv, (B, S, d_v), dtype=jnp.float32)
    # Deterministic pad mask: last two timesteps of every sequence are padding.
    pad_mask = jnp.broadcast_to(jnp.arange(S)[None, :] >= (S - 2), (B, S))

    # Masked path.
    out, attn = scaled_dot_product_attention(q, k, v, pad_mask,
                                             temperature=temperature)
    out = jax.block_until_ready(out)
    attn = jax.block_until_ready(attn)
    ref_out, ref_attn = _reference(q, k, v, pad_mask, temperature=temperature)
    assert out.shape == (B, 1, d_v), out.shape
    assert attn.shape == (B, 1, S), attn.shape
    assert jnp.allclose(out, ref_out, atol=1e-5, rtol=1e-5), "output mismatch"
    assert jnp.allclose(attn, ref_attn, atol=1e-5, rtol=1e-5), "attn mismatch"

    # Unmasked path.
    out2, attn2 = scaled_dot_product_attention(q, k, v, None,
                                               temperature=temperature)
    out2 = jax.block_until_ready(out2)
    ref2_out, ref2_attn = _reference(q, k, v, None, temperature=temperature)
    assert jnp.allclose(out2, ref2_out, atol=1e-5, rtol=1e-5), "output mismatch (no mask)"
    assert jnp.allclose(attn2, ref2_attn, atol=1e-5, rtol=1e-5), "attn mismatch (no mask)"

    print("KERNEL_OK")
</pallas_src>

<mosaic_0001>
module attributes {stable_mosaic.version = 11 : i64} {
  func.func @_sdpa_kernel(%arg0: i32, %arg1: memref<8x32xf32, #tpu.memory_space<vmem>>, %arg2: memref<8x8x32xf32, #tpu.memory_space<vmem>>, %arg3: memref<8x8x32xf32, #tpu.memory_space<vmem>>, %arg4: memref<8x8xi32, #tpu.memory_space<vmem>>, %arg5: memref<8x32xf32, #tpu.memory_space<vmem>>, %arg6: memref<8x8xf32, #tpu.memory_space<vmem>>) attributes {dimension_semantics = [#tpu.dimension_semantics<parallel>], iteration_bounds = array<i64: 1>, scalar_prefetch = 0 : i64, scratch_operands = 0 : i64, tpu.core_type = #tpu.core_type<tc>, window_params = [{transform_indices = @transform_0, window_bounds = array<i64: 8, 32>}, {transform_indices = @transform_1, window_bounds = array<i64: 8, 8, 32>}, {transform_indices = @transform_2, window_bounds = array<i64: 8, 8, 32>}, {transform_indices = @transform_3, window_bounds = array<i64: 8, 8>}, {transform_indices = @transform_4, window_bounds = array<i64: 8, 32>}, {transform_indices = @transform_5, window_bounds = array<i64: 8, 8>}]} {
    %c0 = arith.constant 0 : index
    %c0_0 = arith.constant 0 : index
    %0 = vector.load %arg1[%c0, %c0_0] : memref<8x32xf32, #tpu.memory_space<vmem>>, vector<8x32xf32>
    %c0_1 = arith.constant 0 : index
    %c0_2 = arith.constant 0 : index
    %c0_3 = arith.constant 0 : index
    %1 = vector.load %arg2[%c0_1, %c0_2, %c0_3] : memref<8x8x32xf32, #tpu.memory_space<vmem>>, vector<8x8x32xf32>
    %c0_4 = arith.constant 0 : index
    %c0_5 = arith.constant 0 : index
    %c0_6 = arith.constant 0 : index
    %2 = vector.load %arg3[%c0_4, %c0_5, %c0_6] : memref<8x8x32xf32, #tpu.memory_space<vmem>>, vector<8x8x32xf32>
    %3 = vector.shape_cast %0 : vector<8x32xf32> to vector<8x1x32xf32>
    %4 = vector.broadcast %3 : vector<8x1x32xf32> to vector<8x8x32xf32>
    %5 = arith.mulf %4, %1 : vector<8x8x32xf32>
    %cst = arith.constant dense<0.000000e+00> : vector<8x8xf32>
    %6 = vector.multi_reduction <add>, %5, %cst [2] : vector<8x8x32xf32> to vector<8x8xf32>
    %cst_7 = arith.constant 0.176776692 : f32
    %7 = vector.broadcast %cst_7 : f32 to vector<8x8xf32>
    %8 = arith.mulf %6, %7 : vector<8x8xf32>
    %c0_8 = arith.constant 0 : index
    %c0_9 = arith.constant 0 : index
    %9 = vector.load %arg4[%c0_8, %c0_9] : memref<8x8xi32, #tpu.memory_space<vmem>>, vector<8x8xi32>
    %c0_i32 = arith.constant 0 : i32
    %10 = vector.broadcast %c0_i32 : i32 to vector<8x8xi32>
    %11 = arith.cmpi ne, %9, %10 : vector<8x8xi32>
    %cst_10 = arith.constant -1.000000e+03 : f32
    %12 = vector.broadcast %cst_10 : f32 to vector<8x8xf32>
    %13 = arith.select %11, %12, %8 : vector<8x8xi1>, vector<8x8xf32>
    %cst_11 = arith.constant dense<0xFF800000> : vector<8xf32>
    %14 = vector.multi_reduction <maximumf>, %13, %cst_11 [1] : vector<8x8xf32> to vector<8xf32>
    %15 = vector.shape_cast %14 : vector<8xf32> to vector<8x1xf32>
    %16 = vector.broadcast %15 : vector<8x1xf32> to vector<8x8xf32>
    %17 = arith.subf %13, %16 : vector<8x8xf32>
    %18 = math.exp %17 : vector<8x8xf32>
    %cst_12 = arith.constant dense<0.000000e+00> : vector<8xf32>
    %19 = vector.multi_reduction <add>, %18, %cst_12 [1] : vector<8x8xf32> to vector<8xf32>
    %20 = vector.shape_cast %19 : vector<8xf32> to vector<8x1xf32>
    %21 = tpu.reciprocal %20 : vector<8x1xf32> -> vector<8x1xf32>
    %22 = vector.broadcast %21 : vector<8x1xf32> to vector<8x8xf32>
    %23 = arith.mulf %18, %22 : vector<8x8xf32>
    %c0_13 = arith.constant 0 : index
    %c0_14 = arith.constant 0 : index
    %24 = vector.load %arg6[%c0_13, %c0_14] : memref<8x8xf32, #tpu.memory_space<vmem>>, vector<8x8xf32>
    tpu.vector_store %arg6[%c0_13, %c0_14], %23 {strides = array<i32>} : memref<8x8xf32, #tpu.memory_space<vmem>>, vector<8x8xf32>,
    %25 = vector.shape_cast %23 : vector<8x8xf32> to vector<8x8x1xf32>
    %26 = vector.broadcast %25 : vector<8x8x1xf32> to vector<8x8x32xf32>
    %27 = arith.mulf %26, %2 : vector<8x8x32xf32>
    %cst_15 = arith.constant dense<0.000000e+00> : vector<8x32xf32>
    %28 = vector.multi_reduction <add>, %27, %cst_15 [1] : vector<8x8x32xf32> to vector<8x32xf32>
    %c0_16 = arith.constant 0 : index
    %c0_17 = arith.constant 0 : index
    %29 = vector.load %arg5[%c0_16, %c0_17] : memref<8x32xf32, #tpu.memory_space<vmem>>, vector<8x32xf32>
    tpu.vector_store %arg5[%c0_16, %c0_17], %28 {strides = array<i32>} : memref<8x32xf32, #tpu.memory_space<vmem>>, vector<8x32xf32>,
    return
  }
  func.func @transform_0(%arg0: i32) -> (i32, i32) {
    %c0_i32 = arith.constant 0 : i32
    %c0_i32_0 = arith.constant 0 : i32
    return %arg0, %c0_i32 : i32, i32
  }
  func.func @transform_1(%arg0: i32) -> (i32, i32, i32) {
    %c0_i32 = arith.constant 0 : i32
    %c0_i32_0 = arith.constant 0 : i32
    %c0_i32_1 = arith.constant 0 : i32
    return %arg0, %c0_i32, %c0_i32_0 : i32, i32, i32
  }
  func.func @transform_2(%arg0: i32) -> (i32, i32, i32) {
    %c0_i32 = arith.constant 0 : i32
    %c0_i32_0 = arith.constant 0 : i32
    %c0_i32_1 = arith.constant 0 : i32
    return %arg0, %c0_i32, %c0_i32_0 : i32, i32, i32
  }
  func.func @transform_3(%arg0: i32) -> (i32, i32) {
    %c0_i32 = arith.constant 0 : i32
    %c0_i32_0 = arith.constant 0 : i32
    return %arg0, %c0_i32 : i32, i32
  }
  func.func @transform_4(%arg0: i32) -> (i32, i32) {
    %c0_i32 = arith.constant 0 : i32
    %c0_i32_0 = arith.constant 0 : i32
    return %arg0, %c0_i32 : i32, i32
  }
  func.func @transform_5(%arg0: i32) -> (i32, i32) {
    %c0_i32 = arith.constant 0 : i32
    %c0_i32_0 = arith.constant 0 : i32
    return %arg0, %c0_i32 : i32, i32
  }
}

</mosaic_0001>

<bundles_post_ra>
// kernel: tpu_custom_call.1
= control target key start
LH: loop header
LB: loop body
LE: loop exit
PB: predicated region body
PF: predicated region fallthrough
CT: control target
= control target key end

     0   :  { %11 = vsyncpa [#allocation3], 0  ;;  %s719_s0 = inlined_call_operand.hbm [shape: f32[8,32], index: 0, kind: input, shape index: {}]   ;;  %s720_s1 = inlined_call_operand.hbm [shape: f32[8,8,32], index: 1, kind: input, shape index: {}]   ;;  %s721_s2 = inlined_call_operand.hbm [shape: f32[8,8,32], index: 2, kind: input, shape index: {}]   ;;  %s722_s3 = inlined_call_operand.hbm [shape: s32[8,8], index: 3, kind: input, shape index: {}]   ;;  %s723_s4 = inlined_call_operand.hbm [shape: f32[8,32], index: 4, kind: output, shape index: {0}]   ;;  %s724_s5 = inlined_call_operand.hbm [shape: f32[8,8], index: 5, kind: output, shape index: {1}]  }
   0x1   :  { %12 = vsyncpa [#allocation6], 0 }
   0x2   :  { %13 = vsyncpa [#allocation9], 0 }
   0x3   :  { %14 = vsyncpa [#allocation4], 0 }
   0x4   :  { %15 = vsyncpa [#allocation12], 0  ;;  %s605_s18 = smov [#allocation5]  }
   0x5   :  { %s31_s19 = sshll.u32 %s605_s18, 4  ;;  %s32_s19 = int_to_ptr.vmem [resolvable:$true] %s31_s19 }
   0x6   :  { %s483_s20 = scalar_lea.vmem %s32_s19, 1024  ;;  %p488_p1 = scmp.lt.s32.totalorder %s32_s19, %s32_s19 }
   0x7   :  { %p484_p0 = scmp.ne.s32.totalorder %s32_s19, %s483_s20  ;;  %p489_p2 = scmp.lt.s32.totalorder %s483_s20, %s483_s20 }
   0x9   :  { %p490_p3 = por %p489_p2, %p488_p1 }
   0xb   :  { %p491_p4 = pnand %p490_p3, %p484_p0 }
   0xd   :  { %494 = shalt.err (!%p491_p4)
}
   0xe   :  { %s606_s21 = smov 128   ;;  %s607_s22 = smov 8  }
   0xf   :  { %37 = dma.hbm_to_vmem [thread:$0]  %s720_s1, 1024, %s32_s19, [#allocation6], %s606_s21, %s606_s21, %s607_s22  }
  0x10   :  { %s608_s25 = smov [#allocation2]   ;;  %s609_s27 = smov [#allocation7]  }
  0x11   :  { %s22_s26 = sshll.u32 %s608_s25, 4  ;;  %s43_s28 = sshll.u32 %s609_s27, 4  ;;  %s23_s26 = int_to_ptr.vmem [resolvable:$true] %s22_s26  ;;  %s44_s28 = int_to_ptr.vmem [resolvable:$true] %s43_s28 }
  0x12   :  { %s503_s29 = scalar_lea.vmem %s23_s26, 128  ;;  %p508_p6 = scmp.lt.s32.totalorder %s23_s26, %s23_s26 }
  0x13   :  { %p504_p5 = scmp.ne.s32.totalorder %s23_s26, %s503_s29  ;;  %p509_p7 = scmp.lt.s32.totalorder %s503_s29, %s503_s29 }
  0x15   :  { %p510_p8 = por %p509_p7, %p508_p6 }
  0x17   :  { %p511_p9 = pnand %p510_p8, %p504_p5 }
  0x19   :  { %514 = shalt.err (!%p511_p9)
}
  0x1a   :  { %25 = dma.hbm_to_vmem [thread:$0]  %s719_s0, 128, %s23_s26, [#allocation3]  }
  0x1b   :  { %s523_s7 = scalar_lea.vmem %s44_s28, 1024  ;;  %p528_p11 = scmp.lt.s32.totalorder %s44_s28, %s44_s28 }
  0x1c   :  { %p524_p10 = scmp.ne.s32.totalorder %s44_s28, %s523_s7  ;;  %p529_p12 = scmp.lt.s32.totalorder %s523_s7, %s523_s7 }
  0x1e   :  { %p530_p13 = por %p529_p12, %p528_p11 }
  0x20   :  { %p531_p0 = pnand %p530_p13, %p524_p10 }
  0x22   :  { %534 = shalt.err (!%p531_p0)
}
  0x23   :  { %49 = dma.hbm_to_vmem [thread:$0]  %s721_s2, 1024, %s44_s28, [#allocation6], %s606_s21, %s606_s21, %s607_s22  }
  0x24   :  { %s610_s9 = smov [#allocation8]  }
  0x25   :  { %s56_s10 = sshll.u32 %s610_s9, 4  ;;  %s57_s10 = int_to_ptr.vmem [resolvable:$true] %s56_s10 }
  0x26   :  { %s543_s11 = scalar_lea.vmem %s57_s10, 128  ;;  %p548_p2 = scmp.lt.s32.totalorder %s57_s10, %s57_s10 }
  0x27   :  { %p544_p1 = scmp.ne.s32.totalorder %s57_s10, %s543_s11  ;;  %p549_p3 = scmp.lt.s32.totalorder %s543_s11, %s543_s11 }
  0x29   :  { %p550_p4 = por %p549_p3, %p548_p2 }
  0x2b   :  { %p551_p5 = pnand %p550_p4, %p544_p1 }
  0x2d   :  { %554 = shalt.err (!%p551_p5)
}
  0x2e   :  { %59 = dma.hbm_to_vmem [thread:$0]  %s722_s3, 128, %s57_s10, [#allocation9]  }
  0x2f   :  { %595 = dma.done.wait [#allocation3], 128  }
  0x30   :  { %596 = vsyncadd [#allocation3], 4294967168 }
  0x31   :  { %597 = dma.done.wait [#allocation6], 2048  }
  0x32   :  { %598 = vsyncadd [#allocation6], 4294965248 }
  0x33   :  { %599 = dma.done.wait [#allocation9], 128  }
  0x34   :  { %600 = vsyncadd [#allocation9], 4294967168  ;;  %v94_v0 = vlaneseq  ;;  %v611_v1 = vmov 1966171168   ;;  %v72_v6 = vld [vmem:[#allocation2] sm:$0xff]  ;;  %v73_v13 = vld [vmem:[#allocation5] sm:$0xff] }
  0x35   :  { %v92_v2 = vunpack.c.l.s4 %v611_v1  ;;  %v90_v9 = vcombine.high %v72_v6, %v72_v6  ;;  %vm187_vm0 = vcmask 261120   ;;  %v75_v18 = vld [vmem:[#allocation5 + $0x10] sm:$0xff]  ;;  %v74_v19 = vld [vmem:[#allocation5 + $0x8] sm:$0xff]  ;;  %v77_v25 = vld [vmem:[#allocation5 + $0x20] sm:$0xff]  ;;  %vm264_vm1 = vcmask 1041409   ;;  %s612_s2 = smov [#allocation11]  }
  0x36   :  { %v656_v3 = vshrl.u32 %v94_v0, 7  ;;  %v76_v26 = vld [vmem:[#allocation5 + $0x18] sm:$0xff]  ;;  %v78_v35 = vld [vmem:[#allocation5 + $0x28] sm:$0xff]  ;;  %v79_v42 = vld [vmem:[#allocation5 + $0x30] sm:$0xff]  ;;  %v231_v53 = vand.u32 127, %v94_v0  ;;  %vm266_vm2 = vcmask 1042434  }
  0x37   :  { %v93_v4 = vunpack.c.0.s8 %v92_v2  ;;  %v80_v46 = vld [vmem:[#allocation5 + $0x38] sm:$0xff]  ;;  %vm268_vm3 = vcmask 1043459   ;;  %vm270_vm4 = vcmask 1044484   ;;  %vm272_vm5 = vcmask 1045509   ;;  %s446_s3 = sshll.u32 %s612_s2, 4  ;;  %s447_s3 = int_to_ptr.vmem [resolvable:$true] %s446_s3 }
  0x38   :  { %v660_v8 = vsub.s32 0, %v656_v3  ;;  %v234_v56 = vsub.s32 %v231_v53, %v656_v3  ;;  %vm274_vm6 = vcmask 1046534   ;;  %vm276_vm7 = vcmask 1047559   ;;  %s555_s13 = scalar_lea.vmem %s447_s3, 128  ;;  %p560_p7 = scmp.lt.s32.totalorder %s447_s3, %s447_s3 }
  0x39   :  { %v96_v5 = vsub.s32 %v93_v4, %v656_v3  ;;  %vm280_vm9 = vcmask 64512   ;;  %p556_p6 = scmp.ne.s32.totalorder %s447_s3, %s555_s13  ;;  %p561_p8 = scmp.lt.s32.totalorder %s555_s13, %s555_s13 }
  0x3b   :  { %v97_v7 = vrot.slane %v72_v6, %v96_v5  ;;  %v104_v12 = vrot.slane %v90_v9, %v96_v5  ;;  %p562_p9 = por %p561_p8, %p560_p7 }
  0x3d   :  { %v113_v10 = vrot.slane %v97_v7, %v96_v5  ;;  %v105_v11 = vcombine.high %v97_v7, %v97_v7  ;;  %v120_v17 = vrot.slane %v104_v12, %v96_v5  ;;  %v106_v20 = vcombine.high %v104_v12, %v104_v12  ;;  %p563_p10 = pnand %p562_p9, %p556_p6 }
  0x3f   :  { %v142_v14 = vrot.slane %v113_v10, %v660_v8  ;;  %v135_v15 = vcombine.high %v113_v10, %v113_v10  ;;  %v127_v16 = vrot.slane %v105_v11, %v96_v5  ;;  %v158_v27 = vrot.slane %v120_v17, %v660_v8 }
  0x40   :  { %v134_v28 = vrot.slane %v106_v20, %v96_v5  ;;  %v136_v29 = vcombine.high %v120_v17, %v120_v17 }
  0x41   :  { %v179_v21 = vmul.f32 %v142_v14, %v73_v13  ;;  %v150_v22 = vrot.slane %v135_v15, %v660_v8  ;;  %v146_v23 = vrot.slane %v127_v16, %v660_v8  ;;  %v137_v24 = vcombine.high %v127_v16, %v127_v16 }
  0x42   :  { %v183_v34 = vmul.f32 %v158_v27, %v77_v25  ;;  %v162_v36 = vrot.slane %v134_v28, %v660_v8  ;;  %v138_v37 = vcombine.high %v134_v28, %v134_v28  ;;  %v166_v41 = vrot.slane %v136_v29, %v660_v8 }
  0x43   :  { %v188_v30 = vsel %vm187_vm0, %v179_v21, 0.0  ;;  %v181_v31 = vmul.f32 %v150_v22, %v75_v18  ;;  %v180_v32 = vmul.f32 %v146_v23, %v74_v19  ;;  %v154_v33 = vrot.slane %v137_v24, %v660_v8  ;;  %v220_v18 = vld [vmem:[#allocation8] sm:$0xff] }
  0x44   :  { %189 = vadd.xlane.f32.xlu0 %v188_v30  ;;  %v184_v44 = vmul.f32 %v162_v36, %v78_v35  ;;  %v170_v45 = vrot.slane %v138_v37, %v660_v8  ;;  %v200_v47 = vsel %vm187_vm0, %v183_v34, 0.0  ;;  %v185_v48 = vmul.f32 %v166_v41, %v79_v42 }
  0x45   :  { %v194_v38 = vsel %vm187_vm0, %v181_v31, 0.0  ;;  %v191_v39 = vsel %vm187_vm0, %v180_v32, 0.0  ;;  %v182_v40 = vmul.f32 %v154_v33, %v76_v26  ;;  %vm221_vm8 = vcmp.ne.s32.totalorder %v220_v18, 0 }
  0x46   :  { %195 = vadd.xlane.f32.xlu1 %v194_v38  ;;  %v203_v49 = vsel %vm187_vm0, %v184_v44, 0.0  ;;  %v186_v50 = vmul.f32 %v170_v45, %v80_v46  ;;  %v206_v51 = vsel %vm187_vm0, %v185_v48, 0.0  ;;  %v302_v33 = vsub.s32 1, %v656_v3 }
  0x47   :  { %v197_v43 = vsel %vm187_vm0, %v182_v40, 0.0  ;;  %v309_v38 = vsub.s32 2, %v656_v3  ;;  %v316_v42 = vsub.s32 3, %v656_v3  ;;  %v330_v46 = vsub.s32 5, %v656_v3 }
  0x48   :  { %192 = vadd.xlane.f32.xlu0 %v191_v39  ;;  %v209_v52 = vsel %vm187_vm0, %v186_v50, 0.0  ;;  %v323_v39 = vsub.s32 4, %v656_v3 }
  0x4a   :  { %198 = vadd.xlane.f32.xlu1 %v197_v43  ;;  %v337_v43 = vsub.s32 6, %v656_v3 }
  0x4c   :  { %201 = vadd.xlane.f32.xlu0 %v200_v47  ;;  %v344_v47 = vsub.s32 7, %v656_v3 }
  0x4e   :  { %204 = vadd.xlane.f32.xlu1 %v203_v49 }
  0x50   :  { %207 = vadd.xlane.f32.xlu0 %v206_v51 }
  0x52   :  { %210 = vadd.xlane.f32.xlu1 %v209_v52 }
  0xcd   :  { %v190_v54 = vpop.xlane.xlu0 %189 }
  0xce   :  { %v212_v57 = vmul.f32 0.17677669, %v190_v54 }
  0xcf   :  { %v196_v55 = vpop.xlane.xlu1 %195 }
  0xd0   :  { %v214_v58 = vmul.f32 0.17677669, %v196_v55  ;;  %v235_v62 = vrot.slane %v212_v57, %v234_v56 }
  0xd1   :  { %v193_v59 = vpop.xlane.xlu0 %192 }
  0xd2   :  { %v213_v60 = vmul.f32 0.17677669, %v193_v59  ;;  %v243_v2 = vrot.slane %v214_v58, %v234_v56 }
  0xd3   :  { %v199_v61 = vpop.xlane.xlu1 %198 }
  0xd4   :  { %v239_v63 = vrot.slane %v213_v60, %v234_v56  ;;  %v215_v1 = vmul.f32 0.17677669, %v199_v61 }
  0xd5   :  { %v202_v4 = vpop.xlane.xlu0 %201 }
  0xd6   :  { %v265_v5 = vsel %vm264_vm1, %v239_v63, %v235_v62  ;;  %v247_v0 = vrot.slane %v215_v1, %v234_v56  ;;  %v216_v6 = vmul.f32 0.17677669, %v202_v4 }
  0xd7   :  { %v267_v7 = vsel %vm266_vm2, %v243_v2, %v265_v5  ;;  %v205_v9 = vpop.xlane.xlu1 %204 }
  0xd8   :  { %v269_v10 = vsel %vm268_vm3, %v247_v0, %v267_v7  ;;  %v251_v11 = vrot.slane %v216_v6, %v234_v56  ;;  %v217_v12 = vmul.f32 0.17677669, %v205_v9 }
  0xd9   :  { %v208_v13 = vpop.xlane.xlu0 %207 }
  0xda   :  { %v271_v14 = vsel %vm270_vm4, %v251_v11, %v269_v10  ;;  %v255_v15 = vrot.slane %v217_v12, %v234_v56  ;;  %v218_v16 = vmul.f32 0.17677669, %v208_v13 }
  0xdb   :  { %v211_v17 = vpop.xlane.xlu1 %210 }
  0xdc   :  { %v259_v19 = vrot.slane %v218_v16, %v234_v56  ;;  %v219_v20 = vmul.f32 0.17677669, %v211_v17  ;;  %v273_v21 = vsel %vm272_vm5, %v255_v15, %v271_v14 }
  0xde   :  { %v263_v22 = vrot.slane %v219_v20, %v234_v56  ;;  %v275_v23 = vsel %vm274_vm6, %v259_v19, %v273_v21 }
  0xe0   :  { %v277_v24 = vsel %vm276_vm7, %v263_v22, %v275_v23 }
  0xe1   :  { %v279_v25 = vsel %vm221_vm8, -1000.0, %v277_v24 }
  0xe2   :  { %v281_v26 = vsel %vm280_vm9, %v279_v25, -inf }
  0xe3   :  { %282 = vmax.xlane.f32.xlu0 %v281_v26 }
 0x16c   :  { %v283_v27 = vpop.xlane.xlu0 %282 }
 0x16d   :  { %v284_v28 = vsub.f32 %v279_v25, %v283_v27 }
 0x16f   :  { %v285_v29 = vmul.f32 1.442695, %v284_v28 }
 0x171   :  { %471 = vpow2.f32 %v285_v29 }
 0x17e   :  { %v472_v30 = vpop.eup %471 }
 0x17f   :  { %v287_v31 = vsel %vm280_vm9, %v472_v30, 0.0 }
 0x180   :  { %288 = vadd.xlane.f32.xlu1 %v287_v31 }
 0x209   :  { %v289_v32 = vpop.xlane.xlu1 %288 }
 0x20a   :  { %473 = vrcp.f32 %v289_v32 }
 0x217   :  { %v474_v34 = vpop.eup %473 }
 0x218   :  { %v291_v35 = vmul.f32 %v474_v34, %v472_v30 }
 0x21a   :  { %292 = vst.msk [vmem:[#allocation11] sm:$0xff] %vm280_vm9, %v291_v35  ;;  %v303_v36 = vrot.slane %v291_v35, %v302_v33  ;;  %v296_v37 = vrot.slane %v291_v35, %v660_v8  ;;  %v310_v40 = vrot.slane %v291_v35, %v309_v38  ;;  %v324_v41 = vrot.slane %v291_v35, %v323_v39 }
 0x21b   :  { %v317_v44 = vrot.slane %v291_v35, %v316_v42  ;;  %v338_v45 = vrot.slane %v291_v35, %v337_v43  ;;  %v331_v8 = vrot.slane %v291_v35, %v330_v46  ;;  %v345_v48 = vrot.slane %v291_v35, %v344_v47 }
 0x21c   :  { %305 = vbcast.lane.b32.xlu1 %v303_v36, 256  ;;  %298 = vbcast.lane.b32.xlu0 %v296_v37, 256 }
 0x220   :  { %312 = vbcast.lane.b32.xlu1 %v310_v40, 256  ;;  %326 = vbcast.lane.b32.xlu0 %v324_v41, 256 }
 0x224   :  { %319 = vbcast.lane.b32.xlu1 %v317_v44, 256  ;;  %340 = vbcast.lane.b32.xlu0 %v338_v45, 256 }
 0x228   :  { %333 = vbcast.lane.b32.xlu1 %v331_v8, 256 }
 0x22c   :  { %347 = vbcast.lane.b32.xlu1 %v345_v48, 256 }
 0x22d   :  { %566 = shalt.err (!%p563_p10)
}
 0x22e   :  { %449 = dma.vmem_to_hbm [thread:$0]  %s447_s3, 128, %s724_s5, [#allocation12]   ;;  %v82_v49 = vld [vmem:[#allocation7 + $0x8] sm:$0xff]  ;;  %v81_v50 = vld [vmem:[#allocation7] sm:$0xff]  ;;  %v83_v54 = vld [vmem:[#allocation7 + $0x10] sm:$0xff] }
 0x22f   :  { %v85_v55 = vld [vmem:[#allocation7 + $0x20] sm:$0xff]  ;;  %v84_v4 = vld [vmem:[#allocation7 + $0x18] sm:$0xff]  ;;  %v87_v5 = vld [vmem:[#allocation7 + $0x30] sm:$0xff]  ;;  %s613_s5 = smov [#allocation10]  }
 0x230   :  { %v86_v19 = vld [vmem:[#allocation7 + $0x28] sm:$0xff]  ;;  %v88_v31 = vld [vmem:[#allocation7 + $0x38] sm:$0xff]  ;;  %s436_s16 = sshll.u32 %s613_s5, 4  ;;  %s437_s16 = int_to_ptr.vmem [resolvable:$true] %s436_s16 }
 0x231   :  { %s575_s17 = scalar_lea.vmem %s437_s16, 128  ;;  %p580_p12 = scmp.lt.s32.totalorder %s437_s16, %s437_s16 }
 0x232   :  { %p576_p11 = scmp.ne.s32.totalorder %s437_s16, %s575_s17  ;;  %p581_p13 = scmp.lt.s32.totalorder %s575_s17, %s575_s17 }
 0x234   :  { %p582_p0 = por %p581_p13, %p580_p12 }
 0x236   :  { %p583_p1 = pnand %p582_p0, %p576_p11 }
 0x28e   :  { %v306_v3 = vpop.permute.xlu1 %305  ;;  %v299_v51 = vpop.permute.xlu0 %298 }
 0x28f   :  { %v350_v52 = vmul.f32 %v306_v3, %v82_v49  ;;  %v349_v53 = vmul.f32 %v299_v51, %v81_v50 }
 0x291   :  { %v364_v56 = vsel %vm187_vm0, %v350_v52, 0.0  ;;  %v357_v57 = vsel %vm187_vm0, %v349_v53, 0.0 }
 0x292   :  { %v365_v58 = vrot.slane %v364_v56, 4  ;;  %v358_v59 = vrot.slane %v357_v57, 4  ;;  %v313_v60 = vpop.permute.xlu1 %312  ;;  %v327_v61 = vpop.permute.xlu0 %326 }
 0x293   :  { %v351_v62 = vmul.f32 %v313_v60, %v83_v54  ;;  %v353_v63 = vmul.f32 %v327_v61, %v85_v55 }
 0x294   :  { %v366_v1 = vadd.f32 %v365_v58, %v364_v56  ;;  %v359_v2 = vadd.f32 %v358_v59, %v357_v57 }
 0x295   :  { %v371_v0 = vsel %vm187_vm0, %v351_v62, 0.0  ;;  %v385_v6 = vsel %vm187_vm0, %v353_v63, 0.0 }
 0x296   :  { %v367_v7 = vrot.slane %v366_v1, 2  ;;  %v360_v9 = vrot.slane %v359_v2, 2  ;;  %v372_v10 = vrot.slane %v371_v0, 4  ;;  %v386_v11 = vrot.slane %v385_v6, 4  ;;  %v320_v12 = vpop.permute.xlu1 %319  ;;  %v341_v13 = vpop.permute.xlu0 %340 }
 0x297   :  { %v352_v14 = vmul.f32 %v320_v12, %v84_v4  ;;  %v355_v15 = vmul.f32 %v341_v13, %v87_v5 }
 0x298   :  { %v368_v16 = vadd.f32 %v367_v7, %v366_v1  ;;  %v373_v17 = vadd.f32 %v372_v10, %v371_v0  ;;  %v387_v18 = vadd.f32 %v386_v11, %v385_v6  ;;  %v361_v20 = vadd.f32 %v360_v9, %v359_v2 }
 0x299   :  { %v378_v21 = vsel %vm187_vm0, %v352_v14, 0.0  ;;  %v399_v22 = vsel %vm187_vm0, %v355_v15, 0.0 }
 0x29a   :  { %v374_v23 = vrot.slane %v373_v17, 2  ;;  %v334_v24 = vpop.permute.xlu1 %333  ;;  %v388_v25 = vrot.slane %v387_v18, 2  ;;  %v379_v26 = vrot.slane %v378_v21, 4  ;;  %v400_v27 = vrot.slane %v399_v22, 4 }
 0x29b   :  { %v354_v28 = vmul.f32 %v334_v24, %v86_v19  ;;  %v369_v29 = vrot.slane %v368_v16, 1  ;;  %v362_v32 = vrot.slane %v361_v20, 1 }
 0x29c   :  { %v375_v30 = vadd.f32 %v374_v23, %v373_v17  ;;  %v380_v33 = vadd.f32 %v379_v26, %v378_v21  ;;  %v401_v34 = vadd.f32 %v400_v27, %v399_v22  ;;  %v389_v39 = vadd.f32 %v388_v25, %v387_v18 }
 0x29d   :  { %v392_v35 = vsel %vm187_vm0, %v354_v28, 0.0  ;;  %v370_v44 = vadd.f32 %v369_v29, %v368_v16  ;;  %v363_v45 = vadd.f32 %v362_v32, %v361_v20 }
 0x29e   :  { %v376_v36 = vrot.slane %v375_v30, 1  ;;  %v393_v37 = vrot.slane %v392_v35, 4  ;;  %v348_v38 = vpop.permute.xlu1 %347  ;;  %v381_v40 = vrot.slane %v380_v33, 2  ;;  %v402_v41 = vrot.slane %v401_v34, 2 }
 0x29f   :  { %v356_v42 = vmul.f32 %v348_v38, %v88_v31  ;;  %v390_v50 = vrot.slane %v389_v39, 1  ;;  %v421_v54 = vsel %vm264_vm1, %v370_v44, %v363_v45 }
 0x2a0   :  { %v394_v43 = vadd.f32 %v393_v37, %v392_v35  ;;  %v382_v46 = vadd.f32 %v381_v40, %v380_v33  ;;  %v377_v47 = vadd.f32 %v376_v36, %v375_v30  ;;  %v403_v51 = vadd.f32 %v402_v41, %v401_v34 }
 0x2a1   :  { %v406_v8 = vsel %vm187_vm0, %v356_v42, 0.0  ;;  %v391_v59 = vadd.f32 %v390_v50, %v389_v39 }
 0x2a2   :  { %v395_v48 = vrot.slane %v394_v43, 2  ;;  %v407_v49 = vrot.slane %v406_v8, 4  ;;  %v383_v3 = vrot.slane %v382_v46, 1  ;;  %v422_v56 = vsel %vm266_vm2, %v377_v47, %v421_v54 }
 0x2a3   :  { %v404_v61 = vrot.slane %v403_v51, 1 }
 0x2a4   :  { %v396_v52 = vadd.f32 %v395_v48, %v394_v43  ;;  %v408_v53 = vadd.f32 %v407_v49, %v406_v8  ;;  %v384_v55 = vadd.f32 %v383_v3, %v382_v46 }
 0x2a5   :  { %v405_v5 = vadd.f32 %v404_v61, %v403_v51 }
 0x2a6   :  { %v397_v57 = vrot.slane %v396_v52, 1  ;;  %v409_v58 = vrot.slane %v408_v53, 2  ;;  %v423_v60 = vsel %vm268_vm3, %v384_v55, %v422_v56 }
 0x2a7   :  { %v424_v1 = vsel %vm270_vm4, %v391_v59, %v423_v60 }
 0x2a8   :  { %v398_v62 = vadd.f32 %v397_v57, %v396_v52  ;;  %v410_v63 = vadd.f32 %v409_v58, %v408_v53 }
 0x2aa   :  { %v411_v2 = vrot.slane %v410_v63, 1  ;;  %v425_v4 = vsel %vm272_vm5, %v398_v62, %v424_v1 }
 0x2ab   :  { %v426_v6 = vsel %vm274_vm6, %v405_v5, %v425_v4 }
 0x2ac   :  { %v412_v0 = vadd.f32 %v411_v2, %v410_v63 }
 0x2ae   :  { %v427_v7 = vsel %vm276_vm7, %v412_v0, %v426_v6 }
 0x2af   :  { %429 = vst.msk [vmem:[#allocation10] sm:$0xff] %vm187_vm0, %v427_v7 }
 0x2b0   :  { %586 = shalt.err (!%p583_p1)
}
 0x2b1   :  { %439 = dma.vmem_to_hbm [thread:$0]  %s437_s16, 128, %s723_s4, [#allocation4]  }
 0x2b2   :  { %601 = dma.done.wait [#allocation4], 128  }
 0x2b3   :  { %602 = vsyncadd [#allocation4], 4294967168 }
 0x2b4   :  { %603 = dma.done.wait [#allocation12], 128  }
 0x2b5   :  { %604 = vsyncadd [#allocation12], 4294967168 }
 0x2b6   :  { %456 = vsyncpa [#allocation3], 1 }
 0x2b7   :  { %457 = vsyncpa [#allocation6], 1 }
 0x2b8   :  { %458 = vsyncpa [#allocation9], 1 }
 0x2b9   :  { %459 = vsyncpa [#allocation4], 1 }
 0x2ba   :  { %460 = vsyncpa [#allocation12], 1 }

</bundles_post_ra>
